<compile_context>
chip_gen: v7x
topology: tpu7x:2x2x1
jax: 0.10.0
libtpu: 0.0.40
codegen_flags: <defaults>
</compile_context>

<pallas_src>
import functools

import jax
import jax.numpy as jnp
from jax.experimental import pallas as pl
from jax.experimental.pallas import tpu as pltpu

_TILE_BYTES = 4 * 1024 * 1024          # ~4 MiB per x tile, any dtype
_VMEM_LIMIT_BYTES = 32 * 1024 * 1024   # > v5e's 16 MiB scoped default, safe on all gens


def _element_scale_kernel(x_ref, s_ref, o_ref):
    # s_ref is (br, 1) or (1, bl) in f32 -> VPU broadcast-multiply in f32,
    # cast only the final product to the output dtype.
    o_ref[...] = (x_ref[...] * s_ref[...]).astype(o_ref.dtype)


def _sublane_align(dtype):
    # 8 for 4-byte, 16 for 2-byte, 32 for 1-byte dtypes (packed sublanes).
    return max(8, 32 // jnp.dtype(dtype).itemsize)


def _pick_block(dim, target, align):
    """Full dim if it fits (always legal), else an `align`-multiple <= target."""
    if dim <= target:
        return dim
    return max((target // align) * align, align)


def _halve_block(dim, align):
    """Largest aligned block giving >=2 blocks along `dim`, or None."""
    if dim < 2 * align:
        return None
    return max(align, ((dim // 2) // align) * align)


@functools.partial(jax.jit, static_argnames=("row_target", "tile_bytes"))
def element_scale(x, scale, *, row_target=512, tile_bytes=_TILE_BYTES):
    """x: (N, C, H, W), scale: (1, C, 1, 1) -> x * scale, dtype/shape of x."""
    N, C, H, W = x.shape
    assert scale.shape == (1, C, 1, 1)

    itemsize = jnp.dtype(x.dtype).itemsize
    sub_align = _sublane_align(x.dtype)
    scale_f32 = scale.reshape(C).astype(jnp.float32)

    HW = H * W
    if HW % 128 == 0:
        # Lane-dense (N*C, H*W) view; per-row scale column resident across lanes.
        # (reshape is a bitcast for default row-major contiguous NCHW)
        R, L = N * C, HW
        x2d = x.reshape(R, L)
        s = jnp.tile(scale_f32, (N,)).reshape(R, 1)
        s_block = lambda br, bl: (br, 1)
        s_index = lambda i, j: (i, 0)
    else:
        # Non-128-multiple spatial size (7x7, 14x14, ...): flatten per-sample so
        # the lane axis is C*H*W; scale becomes a repeated row, block (1, bl).
        R, L = N, C * HW
        x2d = x.reshape(R, L)
        s = jnp.repeat(scale_f32, HW).reshape(1, L)
        s_block = lambda br, bl: (1, bl)
        s_index = lambda i, j: (0, j)

    br = _pick_block(R, row_target, sub_align)
    # Lane target chosen so the x tile is ~tile_bytes for this dtype/row block.
    lane_target = max(128, (tile_bytes // (max(br, 1) * itemsize) // 128) * 128)
    bl = _pick_block(L, lane_target, 128)

    # Guarantee >=2 grid blocks when possible: keeps both v7x TensorCores busy
    # and restores DMA/compute pipelining in the otherwise single-block regime.
    if pl.cdiv(R, br) * pl.cdiv(L, bl) == 1:
        new_br = _halve_block(R, sub_align)
        if new_br is not None:
            br = new_br
        else:
            new_bl = _halve_block(L, 128)
            if new_bl is not None:
                bl = new_bl

    grid = (pl.cdiv(R, br), pl.cdiv(L, bl))

    out2d = pl.pallas_call(
        _element_scale_kernel,
        out_shape=jax.ShapeDtypeStruct((R, L), x.dtype),
        grid_spec=pltpu.PrefetchScalarGridSpec(
            num_scalar_prefetch=0,
            grid=grid,
            in_specs=[
                pl.BlockSpec((br, bl), lambda i, j: (i, j)),
                pl.BlockSpec(s_block(br, bl), s_index),
            ],
            out_specs=pl.BlockSpec((br, bl), lambda i, j: (i, j)),
        ),
        compiler_params=pltpu.CompilerParams(
            dimension_semantics=("parallel", "parallel"),
            vmem_limit_bytes=_VMEM_LIMIT_BYTES,
        ),
    )(x2d, s)
    return out2d.reshape(N, C, H, W)


class ElementScale:
    """JAX mirror of the PyTorch ElementScale module (forward pass)."""

    def __init__(self, embed_dims, init_value=0.0):
        # scale = init_value * ones((1, embed_dims, 1, 1)) -- deterministic init
        self.scale = init_value * jnp.ones((1, embed_dims, 1, 1), dtype=jnp.float32)

    def __call__(self, x):
        return element_scale(x, self.scale)


if __name__ == "__main__":
    key = jax.random.PRNGKey(0)
    N, C, H, W = 2, 4, 16, 16
    x = jax.random.normal(key, (N, C, H, W), dtype=jnp.float32)

    mod = ElementScale(embed_dims=C, init_value=0.5)

    out = jax.block_until_ready(mod(x))
    ref = x * mod.scale
    assert out.shape == x.shape and out.dtype == x.dtype
    assert jnp.allclose(out, ref, atol=1e-6, rtol=1e-6)

    # bf16 input: multiply runs in f32 inside the kernel, output stays bf16.
    x_bf = x.astype(jnp.bfloat16)
    out_bf = jax.block_until_ready(mod(x_bf))
    ref_bf = (x_bf.astype(jnp.float32) * mod.scale).astype(jnp.bfloat16)
    assert out_bf.dtype == jnp.bfloat16
    assert jnp.allclose(out_bf.astype(jnp.float32), ref_bf.astype(jnp.float32),
                        atol=1e-2, rtol=1e-2)

    # Non-128-multiple spatial size exercises the (N, C*H*W) fallback path.
    x_odd = jax.random.normal(jax.random.PRNGKey(1), (2, 4, 7, 7), dtype=jnp.float32)
    mod_odd = ElementScale(embed_dims=4, init_value=0.25)
    out_odd = jax.block_until_ready(mod_odd(x_odd))
    assert jnp.allclose(out_odd, x_odd * mod_odd.scale, atol=1e-6, rtol=1e-6)

    print("KERNEL_OK")
</pallas_src>

<mosaic_0001>
module attributes {stable_mosaic.version = 11 : i64} {
  func.func @_element_scale_kernel(%arg0: i32, %arg1: i32, %arg2: memref<8x128xf32, #tpu.memory_space<vmem>>, %arg3: memref<8x1xf32, #tpu.memory_space<vmem>>, %arg4: memref<8x128xf32, #tpu.memory_space<vmem>>) attributes {dimension_semantics = [#tpu.dimension_semantics<parallel>, #tpu.dimension_semantics<parallel>], iteration_bounds = array<i64: 1, 2>, scalar_prefetch = 0 : i64, scratch_operands = 0 : i64, tpu.core_type = #tpu.core_type<tc>, window_params = [{transform_indices = @transform_0, window_bounds = array<i64: 8, 128>}, {transform_indices = @transform_1, window_bounds = array<i64: 8, 1>}, {transform_indices = @transform_2, window_bounds = array<i64: 8, 128>}]} {
    %c0 = arith.constant 0 : index
    %c0_0 = arith.constant 0 : index
    %0 = vector.load %arg2[%c0, %c0_0] : memref<8x128xf32, #tpu.memory_space<vmem>>, vector<8x128xf32>
    %c0_1 = arith.constant 0 : index
    %c0_2 = arith.constant 0 : index
    %1 = vector.load %arg3[%c0_1, %c0_2] : memref<8x1xf32, #tpu.memory_space<vmem>>, vector<8x1xf32>
    %2 = vector.broadcast %1 : vector<8x1xf32> to vector<8x128xf32>
    %3 = arith.mulf %0, %2 : vector<8x128xf32>
    %c0_3 = arith.constant 0 : index
    %c0_4 = arith.constant 0 : index
    %4 = vector.load %arg4[%c0_3, %c0_4] : memref<8x128xf32, #tpu.memory_space<vmem>>, vector<8x128xf32>
    tpu.vector_store %arg4[%c0_3, %c0_4], %3 {strides = array<i32>} : memref<8x128xf32, #tpu.memory_space<vmem>>, vector<8x128xf32>,
    return
  }
  func.func @transform_0(%arg0: i32, %arg1: i32) -> (i32, i32) {
    %c0_i32 = arith.constant 0 : i32
    return %arg0, %arg1 : i32, i32
  }
  func.func @transform_1(%arg0: i32, %arg1: i32) -> (i32, i32) {
    %c0_i32 = arith.constant 0 : i32
    %c0_i32_0 = arith.constant 0 : i32
    return %arg0, %c0_i32 : i32, i32
  }
  func.func @transform_2(%arg0: i32, %arg1: i32) -> (i32, i32) {
    %c0_i32 = arith.constant 0 : i32
    return %arg0, %arg1 : i32, i32
  }
}

</mosaic_0001>

<bundles_post_ra>
// kernel: tile.0
= control target key start
LH: loop header
LB: loop body
LE: loop exit
PB: predicated region body
PF: predicated region fallthrough
CT: control target
= control target key end

     0   :  { %s34_s8 = smov 125   ;;  %vm7_vm0 = vcmask 7168   ;;  %s35_s11 = smov 126   ;;  %s61_s0 = inlined_call_operand.vmem [shape: f32[2,4], index: 0, kind: input, shape index: {}]   ;;  %s62_s1 = inlined_call_operand.vmem [shape: f32[8,1], index: 1, kind: output, shape index: {}]  }
   0x1   :  { %v4_v0 = vld [vmem:[%s61_s0] sm:$0x3]  ;;  %s33_s0 = smov 127  }
   0x2   :  { %5 = vst [vmem:[#allocation0] sm:$0x3] %v4_v0 }
   0x9   :  { %v9_v1 = vld [vmem:[#allocation0] sm:$0x3]  }
   0xa   :  { %v21_v2 = vld [vmem:[#allocation0] sm:$0x3]   ;;  %10 = vrot.lane.b32.xlu0 %v9_v1, %s33_s0 }
   0xb   :  { %22 = vrot.lane.b32.xlu1 %v21_v2, %s34_s8  ;;  %v6_v3 = vld [vmem:[#allocation0] sm:$0x3]  }
   0xc   :  { %v15_v4 = vld [vmem:[#allocation0] sm:$0x3]   ;;  %8 = vst.msk [vmem:[%s62_s1] ss:$4 sm:$0x3] %vm7_vm0, %v6_v3  }
   0xe   :  { %16 = vrot.lane.b32.xlu0 %v15_v4, %s35_s11 }
  0x7c   :  { %v11_v5 = vpop.permute.xlu0 %10  }
  0x7d   :  { %v23_v6 = vpop.permute.xlu1 %22   ;;  %27 = vst.msk [vmem:[%s62_s1 + $0x1] ss:$4 sm:$0x3] %vm7_vm0, %v11_v5  }
  0x7e   :  { %29 = vst.msk [vmem:[%s62_s1 + $0x3] ss:$4 sm:$0x3] %vm7_vm0, %v23_v6  }
  0x80   :  { %v17_v7 = vpop.permute.xlu0 %16  }
  0x81   :  { %28 = vst.msk [vmem:[%s62_s1 + $0x2] ss:$4 sm:$0x3] %vm7_vm0, %v17_v7  }

// kernel: tile.6
= control target key start
LH: loop header
LB: loop body
LE: loop exit
PB: predicated region body
PF: predicated region fallthrough
CT: control target
= control target key end

     0   :  { %s22_s0 = inlined_call_operand.vmem [shape: f32[4], index: 0, kind: input, shape index: {}]   ;;  %s23_s1 = inlined_call_operand.vmem [shape: f32[2,4], index: 1, kind: output, shape index: {}]  }
   0x1   :  { %v4_v0 = vld [vmem:[%s22_s0] ss:$0 sm:$0xff] }
   0x2   :  { %5 = vst [vmem:[%s23_s1] sm:$0x3] %v4_v0 }

// kernel: element_scale.1
= control target key start
LH: loop header
LB: loop body
LE: loop exit
PB: predicated region body
PF: predicated region fallthrough
CT: control target
= control target key end

     0   :  { %s376_s9 = smov 0   ;;  %s378_s10 = smov 0   ;;  %s400_s0 = inlined_call_operand.vmem [shape: f32[8,256], index: 0, kind: input, shape index: {}]   ;;  %s401_s1 = inlined_call_operand.vmem [shape: f32[8,1], index: 1, kind: input, shape index: {}]   ;;  %s402_s2 = inlined_call_operand.vmem [shape: f32[8,256], index: 2, kind: output, shape index: {}]  }
   0x1   :  { %s380_s11 = smov 0  }
   0x2 LB: > { %s21_s12 = sadd.s32 1, %s354_s10  ;;  %p305_p0 = scmp.ge.s32.totalorder %s358_s11, 1  ;;  %s358_s11 = sphi %s380_s11, %s12_s11   ;;  %s354_s10 = sphi %s378_s10, %s404_s10   ;;  %s350_s9 = sphi %s376_s9, %s403_s9  }
   0x3   : > { %p22_p1 = scmp.ge.s32.totalorder %s21_s12, 2  ;;  %p140_p2 = scmp.lt.s32.totalorder %s358_s11, 3 }
   0x5   : > { %s406_s12 = smov (%p22_p1, %s21_s12), 0  ;;  %p141_p3 = pnand %p305_p0, %p140_p2 }
   0x6   : > { %v193_v0 = vld [vmem:[%s401_s1] sm:$0xff] (!%p141_p3)  ;;  %v360_v1 = vmov (!%p141_p3), 0   ;;  %p174_p4 = scmp.lt.s32.totalorder (!%p141_p3), %s350_s9, 1 }
   0x7   : > { %144 = sbr.rel (%p141_p3) target bundleno = 139 (0x8b), region = 28  ;;  %335 = vset.pattern.permute.xlu0 (!%p141_p3), %v360_v1 }
   0x8   : > { %196 = vperm.xlu0 (!%p141_p3), %335, %v193_v0  }
   0xe   : > { %s408_s9 = smov (!%p174_p4, %s350_s9), 1 }
   0xf   : > { %s306_s15 = sshll.u32 %s408_s9, 3 }
  0x10   : > { %s179_s18 = scalar_lea.vmem %s400_s0, %s306_s15  ;;  %s191_s21 = scalar_lea.vmem %s402_s2, %s306_s15 }
  0x11   : > { %v192_v2 = vld [vmem:[%s179_s18] sm:$0xff] }
  0x87   : > { %v197_v3 = vpop.permute.xlu0 %196 }
  0x88   : > { %v199_v4 = vmul.f32 %v197_v3, %v192_v2 }
  0x8a   : > { %200 = vst [vmem:[%s191_s21] sm:$0xff] %v199_v4 }
  0x8b PF: > { %s12_s11 = sadd.s32 1, %s358_s11   ;;  %s403_s9 = smov %s354_s10 }
  0x8c   : > { %p9_p5 = scmp.ge.s32.totalorder %s12_s11, 4   ;;  %s404_s10 = smov %s406_s12 }
  0x8e   :  { %11 = sbr.rel (!%p9_p5) target bundleno = 2 (0x2), region = 61 }

</bundles_post_ra>
